<compile_context>
chip_gen: v5e
topology: v5e:2x2
jax: 0.10.0
libtpu: 0.0.40
codegen_flags: <defaults>
</compile_context>

<pallas_src>
import jax
import jax.numpy as jnp
from jax.experimental import pallas as pl
from jax.experimental.pallas import tpu as pltpu


def _round_up(n, m):
    return ((n + m - 1) // m) * m


def _pad2(a, rows, cols):
    pr, pc = rows - a.shape[0], cols - a.shape[1]
    if pr == 0 and pc == 0:
        return a
    return jnp.pad(a, ((0, pr), (0, pc)))


def _block_vmem_bytes(rows, cols, dtype):
    itemsize = jnp.dtype(dtype).itemsize
    sublane = 8 * max(1, 4 // itemsize)          # 8 rows (f32) / 16 rows (bf16)
    return _round_up(rows, sublane) * _round_up(cols, 128) * itemsize


def _make_popdx_kernel(nk):
    """nk = number of feature_num (K) reduction tiles, closed over statically."""

    def kernel(x_ref, w1_ref, b1_ref, w2_ref, b2_ref, w3_ref, b3_ref,
               w4_ref, b4_ref, yembt_ref, o_ref, acc_ref, h_ref):
        j = pl.program_id(1)

        # ---- layer 1: accumulate x_tile @ w1_tile over the K axis ----------
        @pl.when(j == 0)
        def _first():
            acc_ref[...] = jnp.dot(x_ref[...], w1_ref[...],
                                   preferred_element_type=jnp.float32)

        if nk > 1:
            @pl.when(jnp.logical_and(j > 0, j < nk))
            def _accumulate():
                acc_ref[...] += jnp.dot(x_ref[...], w1_ref[...],
                                        preferred_element_type=jnp.float32)

        # ---- layers 2..4: exactly once per batch tile -----------------------
        @pl.when(j == nk - 1)
        def _mlp():
            cdt = w2_ref.dtype                                  # bf16 (or f32)
            h = jnp.maximum(acc_ref[...] + b1_ref[...], 0.0)    # bias/relu in f32
            h = jnp.dot(h.astype(cdt), w2_ref[...],
                        preferred_element_type=jnp.float32)
            h = jnp.maximum(h + b2_ref[...], 0.0)
            h = jnp.dot(h.astype(cdt), w3_ref[...],
                        preferred_element_type=jnp.float32)
            h = jnp.maximum(h + b3_ref[...], 0.0)
            h = jnp.dot(h.astype(cdt), w4_ref[...],
                        preferred_element_type=jnp.float32)
            h = jnp.maximum(h + b4_ref[...], 0.0)
            h_ref[...] = h.astype(h_ref.dtype)    # persists across label tiles

        # ---- final matmul: one (TB, TL) label tile per step j >= nk-1 ------
        @pl.when(j >= nk - 1)
        def _label_tile():
            o_ref[...] = jnp.dot(h_ref[...], yembt_ref[...],
                                 preferred_element_type=jnp.float32
                                 ).astype(o_ref.dtype)

    return kernel


def prepare_popdx_inputs(params, y_emb, *, use_bf16=True, k_tile=1024,
                         label_tile=4096,
                         w1_resident_max_bytes=32 * 1024 * 1024):
    """One-time padding / casting / tiling decisions (hoisted out of the
    per-call path so the weights are not re-padded and re-cast every forward).

    params: 4 x (w (in,out) == torch W.T, b (out,) or (1,out)); y_emb: (L, E).
    """
    (w1, b1), (w2, b2), (w3, b3), (w4, b4) = params
    b1, b2, b3, b4 = (b.reshape(1, -1) for b in (b1, b2, b3, b4))
    F, H = w1.shape
    E = w4.shape[1]
    L = y_emb.shape[0]

    cdt = jnp.bfloat16 if use_bf16 else jnp.float32
    csize = jnp.dtype(cdt).itemsize

    Hp = _round_up(H, 128)
    Ep = _round_up(E, 128)

    # w1 fully resident when it fits the budget -> no K streaming, no K loop.
    Fp = _round_up(F, 128)
    if Fp * Hp * csize <= w1_resident_max_bytes:
        TK = Fp
    else:
        TK = min(_round_up(k_tile, 128), Fp)
        Fp = _round_up(Fp, TK)
    nk = Fp // TK

    # Label axis is tiled so y_emb^T / output VMEM do not scale with label_num.
    Lp = _round_up(L, 128)
    TL = min(_round_up(label_tile, 128), Lp)
    Lp = _round_up(Lp, TL)
    nl = Lp // TL

    return dict(
        w1=_pad2(w1, Fp, Hp).astype(cdt),
        b1=_pad2(b1, 1, Hp).astype(jnp.float32),
        w2=_pad2(w2, Hp, Hp).astype(cdt),
        b2=_pad2(b2, 1, Hp).astype(jnp.float32),
        w3=_pad2(w3, Hp, Hp).astype(cdt),
        b3=_pad2(b3, 1, Hp).astype(jnp.float32),
        w4=_pad2(w4, Hp, Ep).astype(cdt),
        b4=_pad2(b4, 1, Ep).astype(jnp.float32),
        yembt=_pad2(y_emb.T, Ep, Lp).astype(cdt),     # pre-transposed: (E, L)
        cdt=cdt,
        dims=dict(F=F, H=H, E=E, L=L, Fp=Fp, Hp=Hp, Ep=Ep, Lp=Lp,
                  TK=TK, nk=nk, TL=TL, nl=nl),
    )


def popdx_forward(x, prepared, *, batch_tile=256, min_batch_tiles=1,
                  out_dtype=jnp.float32, vmem_limit_bytes=None,
                  single_buffer_residents=True):
    """x: (B, feature_num).  `prepared` comes from prepare_popdx_inputs()."""
    d = prepared["dims"]
    cdt = prepared["cdt"]
    F, L = d["F"], d["L"]
    Fp, Hp, Ep, Lp = d["Fp"], d["Hp"], d["Ep"], d["Lp"]
    TK, nk, TL, nl = d["TK"], d["nk"], d["TL"], d["nl"]

    B, Fx = x.shape
    assert Fx == F, f"x feature dim {Fx} != prepared feature_num {F}"

    # ---- batch tiling -----------------------------------------------------
    Bp = _round_up(max(B, 8), 8)
    TB = min(_round_up(batch_tile, 8), Bp)
    # v7x megacore: optionally force >= min_batch_tiles "parallel" batch tiles.
    if min_batch_tiles > 1 and Bp // TB < min_batch_tiles and Bp >= 8 * min_batch_tiles:
        TB = _round_up(-(-Bp // min_batch_tiles), 8)
    Bp = _round_up(Bp, TB)
    nb = Bp // TB

    xp = _pad2(x, Bp, Fp).astype(cdt)        # only x is touched per call
    operands = (xp, prepared["w1"], prepared["b1"], prepared["w2"],
                prepared["b2"], prepared["w3"], prepared["b3"],
                prepared["w4"], prepared["b4"], prepared["yembt"])

    # ---- grid & index maps (fused K-then-L phase axis, K first) ------------
    nj = nk + nl - 1

    def x_map(i, j):
        return (i, jnp.minimum(j, nk - 1))

    def w1_map(i, j):
        return (jnp.minimum(j, nk - 1), 0)

    def const_map(i, j):
        return (0, 0)

    def yembt_map(i, j):
        return (0, jnp.maximum(j - (nk - 1), 0))

    def out_map(i, j):
        return (i, jnp.maximum(j - (nk - 1), 0))

    # ---- explicit VMEM budget (never rely on the scoped default) -----------
    if vmem_limit_bytes is None:
        est = (2 * _block_vmem_bytes(TB, TK, cdt)                          # x
               + (1 if nk == 1 else 2) * _block_vmem_bytes(TK, Hp, cdt)    # w1
               + 3 * _block_vmem_bytes(1, Hp, jnp.float32)                 # b1..b3
               + _block_vmem_bytes(1, Ep, jnp.float32)                     # b4
               + 2 * _block_vmem_bytes(Hp, Hp, cdt)                        # w2, w3
               + _block_vmem_bytes(Hp, Ep, cdt)                            # w4
               + (1 if nl == 1 else 2) * _block_vmem_bytes(Ep, TL, cdt)    # y_emb^T
               + 2 * _block_vmem_bytes(TB, TL, out_dtype)                  # output
               + _block_vmem_bytes(TB, Hp, jnp.float32)                    # acc scratch
               + _block_vmem_bytes(TB, Ep, cdt))                           # h scratch
        vmem_limit_bytes = max(32 << 20, min(int(est * 1.25) + (4 << 20), 128 << 20))

    # ---- cost estimate reflecting actual HBM traffic -----------------------
    csize = jnp.dtype(cdt).itemsize
    osize = jnp.dtype(out_dtype).itemsize
    bytes_accessed = int(
        Bp * Fp * csize                                  # x: read once
        + (nb if nk > 1 else 1) * Fp * Hp * csize        # w1: per batch tile if tiled
        + (2 * Hp * Hp + Hp * Ep) * csize                # w2, w3, w4: resident
        + (3 * Hp + Ep) * 4                              # biases
        + (nb if nl > 1 else 1) * Ep * Lp * csize        # y_emb^T
        + Bp * Lp * osize)                               # output writeback
    flops = int(2 * Bp * (Fp * Hp + 2 * Hp * Hp + Hp * Ep + Ep * Lp))
    cost = pl.CostEstimate(flops=flops, transcendentals=0,
                           bytes_accessed=bytes_accessed)

    def run(single_buffer):
        def spec(shape, index_map, constant=False):
            if constant and single_buffer:
                # Constant-index block: a single VMEM buffer is enough.
                return pl.BlockSpec(shape, index_map,
                                    pipeline_mode=pl.Buffered(1))
            return pl.BlockSpec(shape, index_map)

        in_specs = [
            spec((TB, TK), x_map),                        # x: streamed
            spec((TK, Hp), w1_map, constant=(nk == 1)),   # w1: streamed over K (or resident)
            spec((1, Hp), const_map, constant=True),      # b1
            spec((Hp, Hp), const_map, constant=True),     # w2
            spec((1, Hp), const_map, constant=True),      # b2
            spec((Hp, Hp), const_map, constant=True),     # w3
            spec((1, Hp), const_map, constant=True),      # b3
            spec((Hp, Ep), const_map, constant=True),     # w4
            spec((1, Ep), const_map, constant=True),      # b4
            spec((Ep, TL), yembt_map, constant=(nl == 1)),  # y_emb^T: L-tiled
        ]
        out_specs = pl.BlockSpec((TB, TL), out_map)

        return pl.pallas_call(
            _make_popdx_kernel(nk),
            out_shape=jax.ShapeDtypeStruct((Bp, Lp), out_dtype),
            grid=(nb, nj),
            in_specs=in_specs,
            out_specs=out_specs,
            scratch_shapes=[pltpu.VMEM((TB, Hp), jnp.float32),   # layer-1 accumulator
                            pltpu.VMEM((TB, Ep), cdt)],          # MLP output h
            compiler_params=pltpu.CompilerParams(
                dimension_semantics=("parallel", "arbitrary"),
                vmem_limit_bytes=vmem_limit_bytes),
            cost_estimate=cost,
        )(*operands)

    if single_buffer_residents:
        try:
            out_padded = run(True)
        except Exception:
            # JAX build without BlockSpec pipeline_mode / pl.Buffered support:
            # fall back to default double buffering (correctness unchanged).
            out_padded = run(False)
    else:
        out_padded = run(False)

    return out_padded[:B, :L]


def init_params(key, feature_num, hidden_size, emb_dim):
    """kaiming-normal-style weights (stored as (in, out) == torch W.T), zero biases."""
    dims = [(feature_num, hidden_size),
            (hidden_size, hidden_size),
            (hidden_size, hidden_size),
            (hidden_size, emb_dim)]
    params = []
    for fan_in, fan_out in dims:
        key, wk = jax.random.split(key)
        w = jax.random.normal(wk, (fan_in, fan_out), jnp.float32) * jnp.sqrt(2.0 / fan_in)
        b = jnp.zeros((1, fan_out), jnp.float32)
        params.append((w, b))
    return params


def reference_forward(x, params, y_emb, compute_dtype=jnp.float32):
    """Pure-JAX reference.  With compute_dtype=bf16 this mimics the kernel's
    bf16-operand / f32-accumulate matmuls exactly."""
    h = x.astype(jnp.float32)
    for w, b in params:
        h = jnp.dot(h.astype(compute_dtype), w.astype(compute_dtype),
                    preferred_element_type=jnp.float32) + b.reshape(1, -1)
        h = jnp.maximum(h, 0.0)
    return jnp.dot(h.astype(compute_dtype), y_emb.T.astype(compute_dtype),
                   preferred_element_type=jnp.float32)


if __name__ == "__main__":
    key = jax.random.PRNGKey(0)

    # ---- test 1: small shapes; everything fits in a single tile -------------
    B, F, H, L, E = 8, 32, 32, 16, 16
    key, kx, ke, kp = jax.random.split(key, 4)
    x = jax.random.normal(kx, (B, F), jnp.float32)
    y_emb = jax.random.normal(ke, (L, E), jnp.float32)
    params = init_params(kp, F, H, E)

    prepared = prepare_popdx_inputs(params, y_emb, use_bf16=True)
    out = jax.block_until_ready(popdx_forward(x, prepared))
    assert out.shape == (B, L)

    ref_bf16 = reference_forward(x, params, y_emb, compute_dtype=jnp.bfloat16)
    assert jnp.allclose(out, ref_bf16, atol=2e-2, rtol=2e-2), "mismatch vs bf16 reference"
    ref_f32 = reference_forward(x, params, y_emb, compute_dtype=jnp.float32)
    assert jnp.allclose(out, ref_f32, atol=2e-1, rtol=2e-1), "mismatch vs f32 reference"

    # ---- test 2: force every multi-tile path (nb>1, nk>1, nl>1) -------------
    B2, F2, H2, L2, E2 = 24, 384, 64, 320, 64
    key, kx2, ke2, kp2 = jax.random.split(key, 4)
    x2 = jax.random.normal(kx2, (B2, F2), jnp.float32)
    y_emb2 = jax.random.normal(ke2, (L2, E2), jnp.float32)
    params2 = init_params(kp2, F2, H2, E2)

    prepared2 = prepare_popdx_inputs(params2, y_emb2, use_bf16=True,
                                     k_tile=128, label_tile=128,
                                     w1_resident_max_bytes=0)
    out2 = jax.block_until_ready(popdx_forward(x2, prepared2, batch_tile=8))
    assert out2.shape == (B2, L2)
    ref2 = reference_forward(x2, params2, y_emb2, compute_dtype=jnp.bfloat16)
    assert jnp.allclose(out2, ref2, atol=5e-2, rtol=5e-2), "mismatch vs bf16 reference (tiled)"

    print("KERNEL_OK")
</pallas_src>

<mosaic_0001>
module attributes {stable_mosaic.version = 11 : i64} {
  func.func @kernel(%arg0: i32, %arg1: i32, %arg2: memref<8x128xbf16, #tpu.memory_space<vmem>>, %arg3: memref<128x128xbf16, #tpu.memory_space<vmem>>, %arg4: memref<1x128xf32, #tpu.memory_space<vmem>>, %arg5: memref<128x128xbf16, #tpu.memory_space<vmem>>, %arg6: memref<1x128xf32, #tpu.memory_space<vmem>>, %arg7: memref<128x128xbf16, #tpu.memory_space<vmem>>, %arg8: memref<1x128xf32, #tpu.memory_space<vmem>>, %arg9: memref<128x128xbf16, #tpu.memory_space<vmem>>, %arg10: memref<1x128xf32, #tpu.memory_space<vmem>>, %arg11: memref<128x128xbf16, #tpu.memory_space<vmem>>, %arg12: memref<8x128xf32, #tpu.memory_space<vmem>>, %arg13: memref<8x128xf32, #tpu.memory_space<vmem>>, %arg14: memref<8x128xbf16, #tpu.memory_space<vmem>>) attributes {dimension_semantics = [#tpu.dimension_semantics<parallel>, #tpu.dimension_semantics<arbitrary>], iteration_bounds = array<i64: 1, 1>, scalar_prefetch = 0 : i64, scratch_operands = 2 : i64, tpu.core_type = #tpu.core_type<tc>, window_params = [{transform_indices = @transform_0, window_bounds = array<i64: 8, 128>}, {pipeline_mode = #tpu.pipeline_mode<synchronous>, transform_indices = @transform_1, window_bounds = array<i64: 128, 128>}, {pipeline_mode = #tpu.pipeline_mode<synchronous>, transform_indices = @transform_2, window_bounds = array<i64: 1, 128>}, {pipeline_mode = #tpu.pipeline_mode<synchronous>, transform_indices = @transform_3, window_bounds = array<i64: 128, 128>}, {pipeline_mode = #tpu.pipeline_mode<synchronous>, transform_indices = @transform_4, window_bounds = array<i64: 1, 128>}, {pipeline_mode = #tpu.pipeline_mode<synchronous>, transform_indices = @transform_5, window_bounds = array<i64: 128, 128>}, {pipeline_mode = #tpu.pipeline_mode<synchronous>, transform_indices = @transform_6, window_bounds = array<i64: 1, 128>}, {pipeline_mode = #tpu.pipeline_mode<synchronous>, transform_indices = @transform_7, window_bounds = array<i64: 128, 128>}, {pipeline_mode = #tpu.pipeline_mode<synchronous>, transform_indices = @transform_8, window_bounds = array<i64: 1, 128>}, {pipeline_mode = #tpu.pipeline_mode<synchronous>, transform_indices = @transform_9, window_bounds = array<i64: 128, 128>}, {transform_indices = @transform_10, window_bounds = array<i64: 8, 128>}]} {
    %c0_i32 = arith.constant 0 : i32
    %0 = arith.cmpi eq, %arg1, %c0_i32 : i32
    %1 = arith.extui %0 : i1 to i32
    %c0_i32_0 = arith.constant 0 : i32
    %2 = arith.cmpi ne, %1, %c0_i32_0 : i32
    scf.if %2 {
      %c0 = arith.constant 0 : index
      %c0_5 = arith.constant 0 : index
      %9 = vector.load %arg2[%c0, %c0_5] : memref<8x128xbf16, #tpu.memory_space<vmem>>, vector<8x128xbf16>
      %c0_6 = arith.constant 0 : index
      %c0_7 = arith.constant 0 : index
      %10 = vector.load %arg3[%c0_6, %c0_7] : memref<128x128xbf16, #tpu.memory_space<vmem>>, vector<128x128xbf16>
      %cst = arith.constant dense<0.000000e+00> : vector<8x128xf32>
      %11 = tpu.matmul %9, %10, %cst {dimension_numbers = #tpu.dot_dimension_numbers<[1], [0], [0], [1], [0, 0, 1, 1], [], []>} : vector<8x128xbf16>, vector<128x128xbf16>, vector<8x128xf32> -> vector<8x128xf32>
      %c0_8 = arith.constant 0 : index
      %c0_9 = arith.constant 0 : index
      %12 = vector.load %arg13[%c0_8, %c0_9] : memref<8x128xf32, #tpu.memory_space<vmem>>, vector<8x128xf32>
      tpu.vector_store %arg13[%c0_8, %c0_9], %11 {strides = array<i32>} : memref<8x128xf32, #tpu.memory_space<vmem>>, vector<8x128xf32>,
    } else {
    }
    %c0_i32_1 = arith.constant 0 : i32
    %3 = arith.cmpi eq, %arg1, %c0_i32_1 : i32
    %4 = arith.extui %3 : i1 to i32
    %c0_i32_2 = arith.constant 0 : i32
    %5 = arith.cmpi ne, %4, %c0_i32_2 : i32
    scf.if %5 {
      %c0 = arith.constant 0 : index
      %c0_5 = arith.constant 0 : index
      %9 = vector.load %arg13[%c0, %c0_5] : memref<8x128xf32, #tpu.memory_space<vmem>>, vector<8x128xf32>
      %c0_6 = arith.constant 0 : index
      %c0_7 = arith.constant 0 : index
      %10 = vector.load %arg4[%c0_6, %c0_7] : memref<1x128xf32, #tpu.memory_space<vmem>>, vector<1x128xf32>
      %11 = vector.broadcast %10 : vector<1x128xf32> to vector<8x128xf32>
      %12 = arith.addf %9, %11 : vector<8x128xf32>
      %cst = arith.constant 0.000000e+00 : f32
      %13 = vector.broadcast %cst : f32 to vector<8x128xf32>
      %14 = arith.maximumf %12, %13 : vector<8x128xf32>
      %15 = arith.truncf %14 : vector<8x128xf32> to vector<8x128xbf16>
      %c0_8 = arith.constant 0 : index
      %c0_9 = arith.constant 0 : index
      %16 = vector.load %arg5[%c0_8, %c0_9] : memref<128x128xbf16, #tpu.memory_space<vmem>>, vector<128x128xbf16>
      %cst_10 = arith.constant dense<0.000000e+00> : vector<8x128xf32>
      %17 = tpu.matmul %15, %16, %cst_10 {dimension_numbers = #tpu.dot_dimension_numbers<[1], [0], [0], [1], [0, 0, 1, 1], [], []>} : vector<8x128xbf16>, vector<128x128xbf16>, vector<8x128xf32> -> vector<8x128xf32>
      %c0_11 = arith.constant 0 : index
      %c0_12 = arith.constant 0 : index
      %18 = vector.load %arg6[%c0_11, %c0_12] : memref<1x128xf32, #tpu.memory_space<vmem>>, vector<1x128xf32>
      %19 = vector.broadcast %18 : vector<1x128xf32> to vector<8x128xf32>
      %20 = arith.addf %17, %19 : vector<8x128xf32>
      %cst_13 = arith.constant 0.000000e+00 : f32
      %21 = vector.broadcast %cst_13 : f32 to vector<8x128xf32>
      %22 = arith.maximumf %20, %21 : vector<8x128xf32>
      %23 = arith.truncf %22 : vector<8x128xf32> to vector<8x128xbf16>
      %c0_14 = arith.constant 0 : index
      %c0_15 = arith.constant 0 : index
      %24 = vector.load %arg7[%c0_14, %c0_15] : memref<128x128xbf16, #tpu.memory_space<vmem>>, vector<128x128xbf16>
      %cst_16 = arith.constant dense<0.000000e+00> : vector<8x128xf32>
      %25 = tpu.matmul %23, %24, %cst_16 {dimension_numbers = #tpu.dot_dimension_numbers<[1], [0], [0], [1], [0, 0, 1, 1], [], []>} : vector<8x128xbf16>, vector<128x128xbf16>, vector<8x128xf32> -> vector<8x128xf32>
      %c0_17 = arith.constant 0 : index
      %c0_18 = arith.constant 0 : index
      %26 = vector.load %arg8[%c0_17, %c0_18] : memref<1x128xf32, #tpu.memory_space<vmem>>, vector<1x128xf32>
      %27 = vector.broadcast %26 : vector<1x128xf32> to vector<8x128xf32>
      %28 = arith.addf %25, %27 : vector<8x128xf32>
      %cst_19 = arith.constant 0.000000e+00 : f32
      %29 = vector.broadcast %cst_19 : f32 to vector<8x128xf32>
      %30 = arith.maximumf %28, %29 : vector<8x128xf32>
      %31 = arith.truncf %30 : vector<8x128xf32> to vector<8x128xbf16>
      %c0_20 = arith.constant 0 : index
      %c0_21 = arith.constant 0 : index
      %32 = vector.load %arg9[%c0_20, %c0_21] : memref<128x128xbf16, #tpu.memory_space<vmem>>, vector<128x128xbf16>
      %cst_22 = arith.constant dense<0.000000e+00> : vector<8x128xf32>
      %33 = tpu.matmul %31, %32, %cst_22 {dimension_numbers = #tpu.dot_dimension_numbers<[1], [0], [0], [1], [0, 0, 1, 1], [], []>} : vector<8x128xbf16>, vector<128x128xbf16>, vector<8x128xf32> -> vector<8x128xf32>
      %c0_23 = arith.constant 0 : index
      %c0_24 = arith.constant 0 : index
      %34 = vector.load %arg10[%c0_23, %c0_24] : memref<1x128xf32, #tpu.memory_space<vmem>>, vector<1x128xf32>
      %35 = vector.broadcast %34 : vector<1x128xf32> to vector<8x128xf32>
      %36 = arith.addf %33, %35 : vector<8x128xf32>
      %cst_25 = arith.constant 0.000000e+00 : f32
      %37 = vector.broadcast %cst_25 : f32 to vector<8x128xf32>
      %38 = arith.maximumf %36, %37 : vector<8x128xf32>
      %39 = arith.truncf %38 : vector<8x128xf32> to vector<8x128xbf16>
      %c0_26 = arith.constant 0 : index
      %c0_27 = arith.constant 0 : index
      %40 = vector.load %arg14[%c0_26, %c0_27] : memref<8x128xbf16, #tpu.memory_space<vmem>>, vector<8x128xbf16>
      tpu.vector_store %arg14[%c0_26, %c0_27], %39 {strides = array<i32>} : memref<8x128xbf16, #tpu.memory_space<vmem>>, vector<8x128xbf16>,
    } else {
    }
    %c0_i32_3 = arith.constant 0 : i32
    %6 = arith.cmpi sge, %arg1, %c0_i32_3 : i32
    %7 = arith.extui %6 : i1 to i32
    %c0_i32_4 = arith.constant 0 : i32
    %8 = arith.cmpi ne, %7, %c0_i32_4 : i32
    scf.if %8 {
      %c0 = arith.constant 0 : index
      %c0_5 = arith.constant 0 : index
      %9 = vector.load %arg14[%c0, %c0_5] : memref<8x128xbf16, #tpu.memory_space<vmem>>, vector<8x128xbf16>
      %c0_6 = arith.constant 0 : index
      %c0_7 = arith.constant 0 : index
      %10 = vector.load %arg11[%c0_6, %c0_7] : memref<128x128xbf16, #tpu.memory_space<vmem>>, vector<128x128xbf16>
      %cst = arith.constant dense<0.000000e+00> : vector<8x128xf32>
      %11 = tpu.matmul %9, %10, %cst {dimension_numbers = #tpu.dot_dimension_numbers<[1], [0], [0], [1], [0, 0, 1, 1], [], []>} : vector<8x128xbf16>, vector<128x128xbf16>, vector<8x128xf32> -> vector<8x128xf32>
      %c0_8 = arith.constant 0 : index
      %c0_9 = arith.constant 0 : index
      %12 = vector.load %arg12[%c0_8, %c0_9] : memref<8x128xf32, #tpu.memory_space<vmem>>, vector<8x128xf32>
      tpu.vector_store %arg12[%c0_8, %c0_9], %11 {strides = array<i32>} : memref<8x128xf32, #tpu.memory_space<vmem>>, vector<8x128xf32>,
    } else {
    }
    return
  }
  func.func @transform_0(%arg0: i32, %arg1: i32) -> (i32, i32) {
    %c0_i32 = arith.constant 0 : i32
    %0 = arith.minsi %arg1, %c0_i32 : i32
    %c0_i32_0 = arith.constant 0 : i32
    return %arg0, %0 : i32, i32
  }
  func.func @transform_1(%arg0: i32, %arg1: i32) -> (i32, i32) {
    %c0_i32 = arith.constant 0 : i32
    %0 = arith.minsi %arg1, %c0_i32 : i32
    %c0_i32_0 = arith.constant 0 : i32
    %c0_i32_1 = arith.constant 0 : i32
    return %0, %c0_i32_0 : i32, i32
  }
  func.func @transform_2(%arg0: i32, %arg1: i32) -> (i32, i32) {
    %c0_i32 = arith.constant 0 : i32
    %c0_i32_0 = arith.constant 0 : i32
    %c0_i32_1 = arith.constant 0 : i32
    return %c0_i32, %c0_i32_0 : i32, i32
  }
  func.func @transform_3(%arg0: i32, %arg1: i32) -> (i32, i32) {
    %c0_i32 = arith.constant 0 : i32
    %c0_i32_0 = arith.constant 0 : i32
    %c0_i32_1 = arith.constant 0 : i32
    return %c0_i32, %c0_i32_0 : i32, i32
  }
  func.func @transform_4(%arg0: i32, %arg1: i32) -> (i32, i32) {
    %c0_i32 = arith.constant 0 : i32
    %c0_i32_0 = arith.constant 0 : i32
    %c0_i32_1 = arith.constant 0 : i32
    return %c0_i32, %c0_i32_0 : i32, i32
  }
  func.func @transform_5(%arg0: i32, %arg1: i32) -> (i32, i32) {
    %c0_i32 = arith.constant 0 : i32
    %c0_i32_0 = arith.constant 0 : i32
    %c0_i32_1 = arith.constant 0 : i32
    return %c0_i32, %c0_i32_0 : i32, i32
  }
  func.func @transform_6(%arg0: i32, %arg1: i32) -> (i32, i32) {
    %c0_i32 = arith.constant 0 : i32
    %c0_i32_0 = arith.constant 0 : i32
    %c0_i32_1 = arith.constant 0 : i32
    return %c0_i32, %c0_i32_0 : i32, i32
  }
  func.func @transform_7(%arg0: i32, %arg1: i32) -> (i32, i32) {
    %c0_i32 = arith.constant 0 : i32
    %c0_i32_0 = arith.constant 0 : i32
    %c0_i32_1 = arith.constant 0 : i32
    return %c0_i32, %c0_i32_0 : i32, i32
  }
  func.func @transform_8(%arg0: i32, %arg1: i32) -> (i32, i32) {
    %c0_i32 = arith.constant 0 : i32
    %c0_i32_0 = arith.constant 0 : i32
    %c0_i32_1 = arith.constant 0 : i32
    return %c0_i32, %c0_i32_0 : i32, i32
  }
  func.func @transform_9(%arg0: i32, %arg1: i32) -> (i32, i32) {
    %c0_i32 = arith.constant 0 : i32
    %0 = arith.subi %arg1, %c0_i32 : i32
    %c0_i32_0 = arith.constant 0 : i32
    %1 = arith.maxsi %0, %c0_i32_0 : i32
    %c0_i32_1 = arith.constant 0 : i32
    %c0_i32_2 = arith.constant 0 : i32
    return %c0_i32_1, %1 : i32, i32
  }
  func.func @transform_10(%arg0: i32, %arg1: i32) -> (i32, i32) {
    %c0_i32 = arith.constant 0 : i32
    %0 = arith.subi %arg1, %c0_i32 : i32
    %c0_i32_0 = arith.constant 0 : i32
    %1 = arith.maxsi %0, %c0_i32_0 : i32
    %c0_i32_1 = arith.constant 0 : i32
    return %arg0, %1 : i32, i32
  }
}

module attributes {stable_mosaic.version = 11 : i64} {
  func.func @kernel(%arg0: i32, %arg1: i32, %arg2: memref<8x128xbf16, #tpu.memory_space<vmem>>, %arg3: memref<128x128xbf16, #tpu.memory_space<vmem>>, %arg4: memref<1x128xf32, #tpu.memory_space<vmem>>, %arg5: memref<128x128xbf16, #tpu.memory_space<vmem>>, %arg6: memref<1x128xf32, #tpu.memory_space<vmem>>, %arg7: memref<128x128xbf16, #tpu.memory_space<vmem>>, %arg8: memref<1x128xf32, #tpu.memory_space<vmem>>, %arg9: memref<128x128xbf16, #tpu.memory_space<vmem>>, %arg10: memref<1x128xf32, #tpu.memory_space<vmem>>, %arg11: memref<128x128xbf16, #tpu.memory_space<vmem>>, %arg12: memref<8x128xf32, #tpu.memory_space<vmem>>, %arg13: memref<8x128xf32, #tpu.memory_space<vmem>>, %arg14: memref<8x128xbf16, #tpu.memory_space<vmem>>) attributes {dimension_semantics = [#tpu.dimension_semantics<parallel>, #tpu.dimension_semantics<arbitrary>], iteration_bounds = array<i64: 1, 1>, scalar_prefetch = 0 : i64, scratch_operands = 2 : i64, tpu.core_type = #tpu.core_type<tc>, window_params = [{transform_indices = @transform_0, window_bounds = array<i64: 8, 128>}, {transform_indices = @transform_1, window_bounds = array<i64: 128, 128>}, {pipeline_mode = #tpu.pipeline_mode<synchronous>, transform_indices = @transform_2, window_bounds = array<i64: 1, 128>}, {pipeline_mode = #tpu.pipeline_mode<synchronous>, transform_indices = @transform_3, window_bounds = array<i64: 128, 128>}, {pipeline_mode = #tpu.pipeline_mode<synchronous>, transform_indices = @transform_4, window_bounds = array<i64: 1, 128>}, {pipeline_mode = #tpu.pipeline_mode<synchronous>, transform_indices = @transform_5, window_bounds = array<i64: 128, 128>}, {pipeline_mode = #tpu.pipeline_mode<synchronous>, transform_indices = @transform_6, window_bounds = array<i64: 1, 128>}, {pipeline_mode = #tpu.pipeline_mode<synchronous>, transform_indices = @transform_7, window_bounds = array<i64: 128, 128>}, {pipeline_mode = #tpu.pipeline_mode<synchronous>, transform_indices = @transform_8, window_bounds = array<i64: 1, 128>}, {transform_indices = @transform_9, window_bounds = array<i64: 128, 128>}, {transform_indices = @transform_10, window_bounds = array<i64: 8, 128>}]} {
    %c0_i32 = arith.constant 0 : i32
    %0 = arith.cmpi eq, %arg1, %c0_i32 : i32
    %1 = arith.extui %0 : i1 to i32
    %c0_i32_0 = arith.constant 0 : i32
    %2 = arith.cmpi ne, %1, %c0_i32_0 : i32
    scf.if %2 {
      %c0 = arith.constant 0 : index
      %c0_5 = arith.constant 0 : index
      %9 = vector.load %arg2[%c0, %c0_5] : memref<8x128xbf16, #tpu.memory_space<vmem>>, vector<8x128xbf16>
      %c0_6 = arith.constant 0 : index
      %c0_7 = arith.constant 0 : index
      %10 = vector.load %arg3[%c0_6, %c0_7] : memref<128x128xbf16, #tpu.memory_space<vmem>>, vector<128x128xbf16>
      %cst = arith.constant dense<0.000000e+00> : vector<8x128xf32>
      %11 = tpu.matmul %9, %10, %cst {dimension_numbers = #tpu.dot_dimension_numbers<[1], [0], [0], [1], [0, 0, 1, 1], [], []>} : vector<8x128xbf16>, vector<128x128xbf16>, vector<8x128xf32> -> vector<8x128xf32>
      %c0_8 = arith.constant 0 : index
      %c0_9 = arith.constant 0 : index
      %12 = vector.load %arg13[%c0_8, %c0_9] : memref<8x128xf32, #tpu.memory_space<vmem>>, vector<8x128xf32>
      tpu.vector_store %arg13[%c0_8, %c0_9], %11 {strides = array<i32>} : memref<8x128xf32, #tpu.memory_space<vmem>>, vector<8x128xf32>,
    } else {
    }
    %c0_i32_1 = arith.constant 0 : i32
    %3 = arith.cmpi eq, %arg1, %c0_i32_1 : i32
    %4 = arith.extui %3 : i1 to i32
    %c0_i32_2 = arith.constant 0 : i32
    %5 = arith.cmpi ne, %4, %c0_i32_2 : i32
    scf.if %5 {
      %c0 = arith.constant 0 : index
      %c0_5 = arith.constant 0 : index
      %9 = vector.load %arg13[%c0, %c0_5] : memref<8x128xf32, #tpu.memory_space<vmem>>, vector<8x128xf32>
      %c0_6 = arith.constant 0 : index
      %c0_7 = arith.constant 0 : index
      %10 = vector.load %arg4[%c0_6, %c0_7] : memref<1x128xf32, #tpu.memory_space<vmem>>, vector<1x128xf32>
      %11 = vector.broadcast %10 : vector<1x128xf32> to vector<8x128xf32>
      %12 = arith.addf %9, %11 : vector<8x128xf32>
      %cst = arith.constant 0.000000e+00 : f32
      %13 = vector.broadcast %cst : f32 to vector<8x128xf32>
      %14 = arith.maximumf %12, %13 : vector<8x128xf32>
      %15 = arith.truncf %14 : vector<8x128xf32> to vector<8x128xbf16>
      %c0_8 = arith.constant 0 : index
      %c0_9 = arith.constant 0 : index
      %16 = vector.load %arg5[%c0_8, %c0_9] : memref<128x128xbf16, #tpu.memory_space<vmem>>, vector<128x128xbf16>
      %cst_10 = arith.constant dense<0.000000e+00> : vector<8x128xf32>
      %17 = tpu.matmul %15, %16, %cst_10 {dimension_numbers = #tpu.dot_dimension_numbers<[1], [0], [0], [1], [0, 0, 1, 1], [], []>} : vector<8x128xbf16>, vector<128x128xbf16>, vector<8x128xf32> -> vector<8x128xf32>
      %c0_11 = arith.constant 0 : index
      %c0_12 = arith.constant 0 : index
      %18 = vector.load %arg6[%c0_11, %c0_12] : memref<1x128xf32, #tpu.memory_space<vmem>>, vector<1x128xf32>
      %19 = vector.broadcast %18 : vector<1x128xf32> to vector<8x128xf32>
      %20 = arith.addf %17, %19 : vector<8x128xf32>
      %cst_13 = arith.constant 0.000000e+00 : f32
      %21 = vector.broadcast %cst_13 : f32 to vector<8x128xf32>
      %22 = arith.maximumf %20, %21 : vector<8x128xf32>
      %23 = arith.truncf %22 : vector<8x128xf32> to vector<8x128xbf16>
      %c0_14 = arith.constant 0 : index
      %c0_15 = arith.constant 0 : index
      %24 = vector.load %arg7[%c0_14, %c0_15] : memref<128x128xbf16, #tpu.memory_space<vmem>>, vector<128x128xbf16>
      %cst_16 = arith.constant dense<0.000000e+00> : vector<8x128xf32>
      %25 = tpu.matmul %23, %24, %cst_16 {dimension_numbers = #tpu.dot_dimension_numbers<[1], [0], [0], [1], [0, 0, 1, 1], [], []>} : vector<8x128xbf16>, vector<128x128xbf16>, vector<8x128xf32> -> vector<8x128xf32>
      %c0_17 = arith.constant 0 : index
      %c0_18 = arith.constant 0 : index
      %26 = vector.load %arg8[%c0_17, %c0_18] : memref<1x128xf32, #tpu.memory_space<vmem>>, vector<1x128xf32>
      %27 = vector.broadcast %26 : vector<1x128xf32> to vector<8x128xf32>
      %28 = arith.addf %25, %27 : vector<8x128xf32>
      %cst_19 = arith.constant 0.000000e+00 : f32
      %29 = vector.broadcast %cst_19 : f32 to vector<8x128xf32>
      %30 = arith.maximumf %28, %29 : vector<8x128xf32>
      %31 = arith.truncf %30 : vector<8x128xf32> to vector<8x128xbf16>
      %c0_20 = arith.constant 0 : index
      %c0_21 = arith.constant 0 : index
      %32 = vector.load %arg9[%c0_20, %c0_21] : memref<128x128xbf16, #tpu.memory_space<vmem>>, vector<128x128xbf16>
      %cst_22 = arith.constant dense<0.000000e+00> : vector<8x128xf32>
      %33 = tpu.matmul %31, %32, %cst_22 {dimension_numbers = #tpu.dot_dimension_numbers<[1], [0], [0], [1], [0, 0, 1, 1], [], []>} : vector<8x128xbf16>, vector<128x128xbf16>, vector<8x128xf32> -> vector<8x128xf32>
      %c0_23 = arith.constant 0 : index
      %c0_24 = arith.constant 0 : index
      %34 = vector.load %arg10[%c0_23, %c0_24] : memref<1x128xf32, #tpu.memory_space<vmem>>, vector<1x128xf32>
      %35 = vector.broadcast %34 : vector<1x128xf32> to vector<8x128xf32>
      %36 = arith.addf %33, %35 : vector<8x128xf32>
      %cst_25 = arith.constant 0.000000e+00 : f32
      %37 = vector.broadcast %cst_25 : f32 to vector<8x128xf32>
      %38 = arith.maximumf %36, %37 : vector<8x128xf32>
      %39 = arith.truncf %38 : vector<8x128xf32> to vector<8x128xbf16>
      %c0_26 = arith.constant 0 : index
      %c0_27 = arith.constant 0 : index
      %40 = vector.load %arg14[%c0_26, %c0_27] : memref<8x128xbf16, #tpu.memory_space<vmem>>, vector<8x128xbf16>
      tpu.vector_store %arg14[%c0_26, %c0_27], %39 {strides = array<i32>} : memref<8x128xbf16, #tpu.memory_space<vmem>>, vector<8x128xbf16>,
    } else {
    }
    %c0_i32_3 = arith.constant 0 : i32
    %6 = arith.cmpi sge, %arg1, %c0_i32_3 : i32
    %7 = arith.extui %6 : i1 to i32
    %c0_i32_4 = arith.constant 0 : i32
    %8 = arith.cmpi ne, %7, %c0_i32_4 : i32
    scf.if %8 {
      %c0 = arith.constant 0 : index
      %c0_5 = arith.constant 0 : index
      %9 = vector.load %arg14[%c0, %c0_5] : memref<8x128xbf16, #tpu.memory_space<vmem>>, vector<8x128xbf16>
      %c0_6 = arith.constant 0 : index
      %c0_7 = arith.constant 0 : index
      %10 = vector.load %arg11[%c0_6, %c0_7] : memref<128x128xbf16, #tpu.memory_space<vmem>>, vector<128x128xbf16>
      %cst = arith.constant dense<0.000000e+00> : vector<8x128xf32>
      %11 = tpu.matmul %9, %10, %cst {dimension_numbers = #tpu.dot_dimension_numbers<[1], [0], [0], [1], [0, 0, 1, 1], [], []>} : vector<8x128xbf16>, vector<128x128xbf16>, vector<8x128xf32> -> vector<8x128xf32>
      %c0_8 = arith.constant 0 : index
      %c0_9 = arith.constant 0 : index
      %12 = vector.load %arg12[%c0_8, %c0_9] : memref<8x128xf32, #tpu.memory_space<vmem>>, vector<8x128xf32>
      tpu.vector_store %arg12[%c0_8, %c0_9], %11 {strides = array<i32>} : memref<8x128xf32, #tpu.memory_space<vmem>>, vector<8x128xf32>,
    } else {
    }
    return
  }
  func.func @transform_0(%arg0: i32, %arg1: i32) -> (i32, i32) {
    %c0_i32 = arith.constant 0 : i32
    %0 = arith.minsi %arg1, %c0_i32 : i32
    %c0_i32_0 = arith.constant 0 : i32
    return %arg0, %0 : i32, i32
  }
  func.func @transform_1(%arg0: i32, %arg1: i32) -> (i32, i32) {
    %c0_i32 = arith.constant 0 : i32
    %0 = arith.minsi %arg1, %c0_i32 : i32
    %c0_i32_0 = arith.constant 0 : i32
    %c0_i32_1 = arith.constant 0 : i32
    return %0, %c0_i32_0 : i32, i32
  }
  func.func @transform_2(%arg0: i32, %arg1: i32) -> (i32, i32) {
    %c0_i32 = arith.constant 0 : i32
    %c0_i32_0 = arith.constant 0 : i32
    %c0_i32_1 = arith.constant 0 : i32
    return %c0_i32, %c0_i32_0 : i32, i32
  }
  func.func @transform_3(%arg0: i32, %arg1: i32) -> (i32, i32) {
    %c0_i32 = arith.constant 0 : i32
    %c0_i32_0 = arith.constant 0 : i32
    %c0_i32_1 = arith.constant 0 : i32
    return %c0_i32, %c0_i32_0 : i32, i32
  }
  func.func @transform_4(%arg0: i32, %arg1: i32) -> (i32, i32) {
    %c0_i32 = arith.constant 0 : i32
    %c0_i32_0 = arith.constant 0 : i32
    %c0_i32_1 = arith.constant 0 : i32
    return %c0_i32, %c0_i32_0 : i32, i32
  }
  func.func @transform_5(%arg0: i32, %arg1: i32) -> (i32, i32) {
    %c0_i32 = arith.constant 0 : i32
    %c0_i32_0 = arith.constant 0 : i32
    %c0_i32_1 = arith.constant 0 : i32
    return %c0_i32, %c0_i32_0 : i32, i32
  }
  func.func @transform_6(%arg0: i32, %arg1: i32) -> (i32, i32) {
    %c0_i32 = arith.constant 0 : i32
    %c0_i32_0 = arith.constant 0 : i32
    %c0_i32_1 = arith.constant 0 : i32
    return %c0_i32, %c0_i32_0 : i32, i32
  }
  func.func @transform_7(%arg0: i32, %arg1: i32) -> (i32, i32) {
    %c0_i32 = arith.constant 0 : i32
    %c0_i32_0 = arith.constant 0 : i32
    %c0_i32_1 = arith.constant 0 : i32
    return %c0_i32, %c0_i32_0 : i32, i32
  }
  func.func @transform_8(%arg0: i32, %arg1: i32) -> (i32, i32) {
    %c0_i32 = arith.constant 0 : i32
    %c0_i32_0 = arith.constant 0 : i32
    %c0_i32_1 = arith.constant 0 : i32
    return %c0_i32, %c0_i32_0 : i32, i32
  }
  func.func @transform_9(%arg0: i32, %arg1: i32) -> (i32, i32) {
    %c0_i32 = arith.constant 0 : i32
    %0 = arith.subi %arg1, %c0_i32 : i32
    %c0_i32_0 = arith.constant 0 : i32
    %1 = arith.maxsi %0, %c0_i32_0 : i32
    %c0_i32_1 = arith.constant 0 : i32
    %c0_i32_2 = arith.constant 0 : i32
    return %c0_i32_1, %1 : i32, i32
  }
  func.func @transform_10(%arg0: i32, %arg1: i32) -> (i32, i32) {
    %c0_i32 = arith.constant 0 : i32
    %0 = arith.subi %arg1, %c0_i32 : i32
    %c0_i32_0 = arith.constant 0 : i32
    %1 = arith.maxsi %0, %c0_i32_0 : i32
    %c0_i32_1 = arith.constant 0 : i32
    return %arg0, %1 : i32, i32
  }
}

</mosaic_0001>

<bundles_post_ra>
// kernel: tpu_custom_call.1
= control target key start
LH: loop header
LB: loop body
LE: loop exit
PB: predicated region body
PF: predicated region fallthrough
CT: control target
= control target key end

     0   :  { %15 = vsyncpa [#allocation5], 0  ;;  %s1075_s0 = inlined_call_operand.hbm [shape: bf16[8,128], index: 0, kind: input, shape index: {}]   ;;  %s1076_s1 = inlined_call_operand.hbm [shape: bf16[128,128], index: 1, kind: input, shape index: {}]   ;;  %s1077_s2 = inlined_call_operand.vmem [shape: f32[1,128], index: 2, kind: input, shape index: {}]   ;;  %s1078_s3 = inlined_call_operand.hbm [shape: bf16[128,128], index: 3, kind: input, shape index: {}]   ;;  %s1079_s4 = inlined_call_operand.vmem [shape: f32[1,128], index: 4, kind: input, shape index: {}]   ;;  %s1080_s5 = inlined_call_operand.hbm [shape: bf16[128,128], index: 5, kind: input, shape index: {}]   ;;  %s1081_s6 = inlined_call_operand.vmem [shape: f32[1,128], index: 6, kind: input, shape index: {}]   ;;  %s1082_s7 = inlined_call_operand.hbm [shape: bf16[128,128], index: 7, kind: input, shape index: {}]   ;;  %s1083_s8 = inlined_call_operand.vmem [shape: f32[1,128], index: 8, kind: input, shape index: {}]   ;;  %s1084_s9 = inlined_call_operand.hbm [shape: bf16[128,128], index: 9, kind: input, shape index: {}]   ;;  %s1085_s10 = inlined_call_operand.hbm [shape: f32[8,128], index: 10, kind: output, shape index: {}]  }
   0x1   :  { %16 = vsyncpa [#allocation8], 0 }
   0x2   :  { %17 = vsyncpa [#allocation11], 0 }
   0x3   :  { %18 = vsyncpa [#allocation14], 0  ;;  %s35_s15 = sshll.u32 %s1076_s1, 4  ;;  %s36_s15 = int_to_ptr.hbm [resolvable:$true] %s35_s15 }
   0x4   :  { %19 = vsyncpa [#allocation6], 0  ;;  %s963_s16 = smov [#allocation7]   ;;  %s65_s20 = sshll.u32 %s1080_s5, 4  ;;  %s66_s20 = int_to_ptr.hbm [resolvable:$true] %s65_s20 }
   0x5   :  { %s37_s17 = sshll.u32 %s963_s16, 4  ;;  %s964_s21 = smov 64   ;;  %s38_s17 = int_to_ptr.vmem [resolvable:$true] %s37_s17 }
   0x6   :  { %s965_s22 = smov 4   ;;  %s966_s23 = smov [#allocation10]  }
   0x7   :  { %43 = dma.hbm_to_vmem [thread:$0]  %s36_s15, 1024, %s38_s17, [#allocation8], %s964_s21, %s964_s21, %s965_s22  }
   0x8   :  { %s67_s24 = sshll.u32 %s966_s23, 4  ;;  %s25_s26 = sshll.u32 %s1075_s0, 4  ;;  %s68_s24 = int_to_ptr.vmem [resolvable:$true] %s67_s24  ;;  %s26_s26 = int_to_ptr.hbm [resolvable:$true] %s25_s26 }
   0x9   :  { %73 = dma.hbm_to_vmem [thread:$0]  %s66_s20, 1024, %s68_s24, [#allocation11], %s964_s21, %s964_s21, %s965_s22  }
   0xa   :  { %s50_s28 = sshll.u32 %s1078_s3, 4  ;;  %s967_s29 = smov [#allocation4]   ;;  %s51_s28 = int_to_ptr.hbm [resolvable:$true] %s50_s28 }
   0xb   :  { %s27_s30 = sshll.u32 %s967_s29, 4  ;;  %s968_s11 = smov [#allocation9]   ;;  %s28_s30 = int_to_ptr.vmem [resolvable:$true] %s27_s30 }
   0xc   :  { %30 = dma.hbm_to_vmem [thread:$0]  %s26_s26, 64, %s28_s30, [#allocation5]  }
   0xd   :  { %s52_s12 = sshll.u32 %s968_s11, 4  ;;  %s80_s0 = sshll.u32 %s1082_s7, 4  ;;  %s53_s12 = int_to_ptr.vmem [resolvable:$true] %s52_s12  ;;  %s81_s0 = int_to_ptr.hbm [resolvable:$true] %s80_s0 }
   0xe   :  { %58 = dma.hbm_to_vmem [thread:$0]  %s51_s28, 1024, %s53_s12, [#allocation8], %s964_s21, %s964_s21, %s965_s22  }
   0xf   :  { %s95_s3 = sshll.u32 %s1084_s9, 4  ;;  %s969_s17 = smov [#allocation12]   ;;  %s96_s3 = int_to_ptr.hbm [resolvable:$true] %s95_s3 }
  0x10   :  { %s82_s18 = sshll.u32 %s969_s17, 4  ;;  %s970_s19 = smov [#allocation13]   ;;  %s83_s18 = int_to_ptr.vmem [resolvable:$true] %s82_s18 }
  0x11   :  { %88 = dma.hbm_to_vmem [thread:$0]  %s81_s0, 1024, %s83_s18, [#allocation11], %s964_s21, %s964_s21, %s965_s22  }
  0x12   :  { %s97_s7 = sshll.u32 %s970_s19, 4  ;;  %s98_s7 = int_to_ptr.vmem [resolvable:$true] %s97_s7 }
  0x13   :  { %103 = dma.hbm_to_vmem [thread:$0]  %s96_s3, 1024, %s98_s7, [#allocation14], %s964_s21, %s964_s21, %s965_s22  }
  0x14   :  { %953 = dma.done.wait [#allocation5], 64  }
  0x15   :  { %954 = vsyncadd [#allocation5], 4294967232 }
  0x16   :  { %955 = dma.done.wait [#allocation8], 2048  }
  0x17   :  { %956 = vsyncadd [#allocation8], 4294965248 }
  0x18   :  { %957 = dma.done.wait [#allocation11], 2048  }
  0x19   :  { %958 = vsyncadd [#allocation11], 4294965248 }
  0x1a   :  { %959 = dma.done.wait [#allocation14], 1024  }
  0x1b   :  { %960 = vsyncadd [#allocation14], 4294966272  ;;  %v739_v0 = vld [vmem:[#allocation7 + $0x38] sm:$0xff]  ;;  %v738_v1 = vld [vmem:[#allocation7 + $0x30] sm:$0xff]  ;;  %s559_s5 = sshll.u32 %s1085_s10, 4  ;;  %s560_s5 = int_to_ptr.hbm [resolvable:$true] %s559_s5 }
  0x1c   :  { %197 = vmatpush.bf16.msra.mxu0 %v739_v0  ;;  %v747_v2 = vld [vmem:[#allocation9 + $0x38] sm:$0xff]  ;;  %v746_v3 = vld [vmem:[#allocation9 + $0x30] sm:$0xff]  ;;  %v737_v4 = vld [vmem:[#allocation7 + $0x28] sm:$0xff] }
  0x1d   :  { %287 = vmatpush.bf16.msra.mxu1 %v747_v2  ;;  %v745_v5 = vld [vmem:[#allocation9 + $0x28] sm:$0xff]  ;;  %v736_v6 = vld [vmem:[#allocation7 + $0x20] sm:$0xff]  ;;  %v735_v8 = vld [vmem:[#allocation7 + $0x18] sm:$0xff] }
  0x1e   :  { %v744_v7 = vld [vmem:[#allocation9 + $0x20] sm:$0xff]  ;;  %v743_v9 = vld [vmem:[#allocation9 + $0x18] sm:$0xff]  ;;  %v734_v10 = vld [vmem:[#allocation7 + $0x10] sm:$0xff] }
  0x1f   :  { %v742_v11 = vld [vmem:[#allocation9 + $0x10] sm:$0xff]  ;;  %v733_v12 = vld [vmem:[#allocation7 + $0x8] sm:$0xff]  ;;  %v732_v13 = vld [vmem:[#allocation7] sm:$0xff] }
  0x20   :  { %198 = vmatpush.bf16.msra.mxu0 %v738_v1  ;;  %v132_v14 = vld [vmem:[#allocation4] sm:$0xf]  ;;  %v741_v15 = vld [vmem:[#allocation9 + $0x8] sm:$0xff]  ;;  %v740_v16 = vld [vmem:[#allocation9] sm:$0xff] }
  0x21   :  { %288 = vmatpush.bf16.msra.mxu1 %v746_v3  ;;  %v755_v17 = vld [vmem:[#allocation10 + $0x38] sm:$0xff]  ;;  %v754_v18 = vld [vmem:[#allocation10 + $0x30] sm:$0xff]  ;;  %v753_v19 = vld [vmem:[#allocation10 + $0x28] sm:$0xff] }
  0x22   :  { %370 = vmatpush.bf16.msra.mxu2 %v755_v17  ;;  %v752_v20 = vld [vmem:[#allocation10 + $0x20] sm:$0xff]  ;;  %v751_v21 = vld [vmem:[#allocation10 + $0x18] sm:$0xff]  ;;  %v750_v22 = vld [vmem:[#allocation10 + $0x10] sm:$0xff] }
  0x23   :  { %v781_v23 = vld [vmem:[%s1077_s2] ss:$0 sm:$0xff]  ;;  %v749_v29 = vld [vmem:[#allocation10 + $0x8] sm:$0xff]  ;;  %v748_v30 = vld [vmem:[#allocation10] sm:$0xff] }
  0x24   :  { %199 = vmatpush.bf16.msra.mxu0 %v737_v4  ;;  %v763_v31 = vld [vmem:[#allocation12 + $0x38] sm:$0xff]  ;;  %v762_v32 = vld [vmem:[#allocation12 + $0x30] sm:$0xff]  ;;  %v761_v33 = vld [vmem:[#allocation12 + $0x28] sm:$0xff] }
  0x25   :  { %289 = vmatpush.bf16.msra.mxu1 %v745_v5  ;;  %453 = vmatpush.bf16.msra.mxu3 %v763_v31  ;;  %v760_v34 = vld [vmem:[#allocation12 + $0x20] sm:$0xff]  ;;  %v759_v35 = vld [vmem:[#allocation12 + $0x18] sm:$0xff]  ;;  %v758_v36 = vld [vmem:[#allocation12 + $0x10] sm:$0xff] }
  0x26   :  { %371 = vmatpush.bf16.msra.mxu2 %v754_v18  ;;  %v782_v37 = vld [vmem:[%s1079_s4] ss:$0 sm:$0xff]  ;;  %v757_v43 = vld [vmem:[#allocation12 + $0x8] sm:$0xff]  ;;  %v756_v44 = vld [vmem:[#allocation12] sm:$0xff] }
  0x27   :  { %v771_v45 = vld [vmem:[#allocation13 + $0x38] sm:$0xff]  ;;  %v770_v46 = vld [vmem:[#allocation13 + $0x30] sm:$0xff]  ;;  %v769_v47 = vld [vmem:[#allocation13 + $0x28] sm:$0xff] }
  0x28   :  { %200 = vmatpush.bf16.msra.mxu0 %v736_v6  ;;  %v768_v48 = vld [vmem:[#allocation13 + $0x20] sm:$0xff]  ;;  %v783_v49 = vld [vmem:[%s1081_s6] ss:$0 sm:$0xff]  ;;  %v766_v56 = vld [vmem:[#allocation13 + $0x10] sm:$0xff]  ;;  %s971_s6 = smov [#allocation15]  }
  0x29   :  { %290 = vmatpush.bf16.msra.mxu1 %v744_v7  ;;  %454 = vmatpush.bf16.msra.mxu3 %v762_v32  ;;  %v767_v55 = vld [vmem:[#allocation13 + $0x18] sm:$0xff]  ;;  %v765_v57 = vld [vmem:[#allocation13 + $0x8] sm:$0xff]  ;;  %v764_v58 = vld [vmem:[#allocation13] sm:$0xff]  ;;  %s557_s25 = sshll.u32 %s971_s6, 4  ;;  %s558_s25 = int_to_ptr.vmem [resolvable:$true] %s557_s25 }
  0x2a   :  { %372 = vmatpush.bf16.msra.mxu2 %v753_v19  ;;  %v784_v59 = vld [vmem:[%s1083_s8] ss:$0 sm:$0xff] }
  0x2c   :  { %201 = vmatpush.bf16.msra.mxu0 %v735_v8 }
  0x2d   :  { %291 = vmatpush.bf16.msra.mxu1 %v743_v9  ;;  %455 = vmatpush.bf16.msra.mxu3 %v761_v33 }
  0x2e   :  { %373 = vmatpush.bf16.msra.mxu2 %v752_v20 }
  0x30   :  { %202 = vmatpush.bf16.msra.mxu0 %v734_v10 }
  0x31   :  { %292 = vmatpush.bf16.msra.mxu1 %v742_v11  ;;  %456 = vmatpush.bf16.msra.mxu3 %v760_v34 }
  0x32   :  { %374 = vmatpush.bf16.msra.mxu2 %v751_v21 }
  0x34   :  { %203 = vmatpush.bf16.msra.mxu0 %v733_v12 }
  0x35   :  { %293 = vmatpush.bf16.msra.mxu1 %v741_v15  ;;  %457 = vmatpush.bf16.msra.mxu3 %v759_v35 }
  0x36   :  { %375 = vmatpush.bf16.msra.mxu2 %v750_v22 }
  0x38   :  { %204 = vmatpush.bf16.msra.mxu0 %v732_v13 }
  0x39   :  { %294 = vmatpush.bf16.msra.mxu1 %v740_v16  ;;  %458 = vmatpush.bf16.msra.mxu3 %v758_v36 }
  0x3a   :  { %376 = vmatpush.bf16.msra.mxu2 %v749_v29 }
  0x3b   :  { %205 = vmatmul.bf16.vlgmr.msra.gmra.mxu0 %v132_v14 }
  0x3c   :  { %538 = vmatpush.bf16.msrb.mxu0 %v771_v45 }
  0x3d   :  { %459 = vmatpush.bf16.msra.mxu3 %v757_v43 }
  0x3e   :  { %377 = vmatpush.bf16.msra.mxu2 %v748_v30 }
  0x40   :  { %539 = vmatpush.bf16.msrb.mxu0 %v770_v46 }
  0x41   :  { %460 = vmatpush.bf16.msra.mxu3 %v756_v44 }
  0x44   :  { %540 = vmatpush.bf16.msrb.mxu0 %v769_v47 }
  0x48   :  { %541 = vmatpush.bf16.msrb.mxu0 %v768_v48 }
  0x4c   :  { %542 = vmatpush.bf16.msrb.mxu0 %v767_v55 }
  0x50   :  { %543 = vmatpush.bf16.msrb.mxu0 %v766_v56 }
  0x54   :  { %544 = vmatpush.bf16.msrb.mxu0 %v765_v57 }
  0x58   :  { %545 = vmatpush.bf16.msrb.mxu0 %v764_v58 }
  0xb8   :  { %v206_v24 = vpop.f32.mrf.mxu0 }
  0xb9   :  { %v216_v25 = vadd.f32 %v781_v23, %v206_v24 }
  0xbb   :  { %v217_v26 = vmax.f32 %v216_v25, 0.0 }
  0xbd   :  { %v218_v27 = vpack.c.bf16 %v217_v26, %v217_v26 }
  0xbf   :  { %295 = vmatmul.bf16.vlgmr.msra.gmra.mxu1 %v218_v27 }
  0xc0   :  { %v208_v28 = vpop.f32.mrf.mxu0 }
 0x13c   :  { %v296_v38 = vpop.f32.mrf.mxu1 }
 0x13d   :  { %v297_v39 = vadd.f32 %v782_v37, %v296_v38 }
 0x13f   :  { %v300_v40 = vmax.f32 %v297_v39, 0.0 }
 0x141   :  { %v301_v41 = vpack.c.bf16 %v300_v40, %v300_v40 }
 0x143   :  { %378 = vmatmul.bf16.vlgmr.msra.gmra.mxu2 %v301_v41 }
 0x144   :  { %v298_v42 = vpop.f32.mrf.mxu1 }
 0x1c6   :  { %v379_v50 = vpop.f32.mrf.mxu2 }
 0x1c7   :  { %v380_v51 = vadd.f32 %v783_v49, %v379_v50 }
 0x1c9   :  { %v383_v52 = vmax.f32 %v380_v51, 0.0 }
 0x1cb   :  { %v384_v53 = vpack.c.bf16 %v383_v52, %v383_v52 }
 0x1cd   :  { %461 = vmatmul.bf16.vlgmr.msra.gmra.mxu3 %v384_v53 }
 0x1ce   :  { %v381_v54 = vpop.f32.mrf.mxu2 }
 0x250   :  { %v462_v60 = vpop.f32.mrf.mxu3 }
 0x251   :  { %v463_v61 = vadd.f32 %v784_v59, %v462_v60 }
 0x253   :  { %v466_v62 = vmax.f32 %v463_v61, 0.0 }
 0x255   :  { %v467_v63 = vpack.c.bf16 %v466_v62, %v466_v62 }
 0x257   :  { %468 = vst [vmem:[#allocation3] sm:$0xf] %v467_v63 }
 0x258   :  { %v464_v0 = vpop.f32.mrf.mxu3 }
 0x25e   :  { %v473_v1 = vld [vmem:[#allocation3] sm:$0xf] }
 0x25f   :  { %546 = vmatmul.bf16.vlgmr.msrb.gmra.mxu0 %v473_v1 }
 0x2dc   :  { %v547_v2 = vpop.f32.mrf.mxu0 }
 0x2dd   :  { %551 = vst [vmem:[#allocation15] sm:$0xff] %v547_v2 }
 0x2de   :  { %562 = dma.vmem_to_hbm [thread:$0]  %s558_s25, 128, %s560_s5, [#allocation6]  }
 0x2e4   :  { %v549_v3 = vpop.f32.mrf.mxu0 }
 0x2e5   :  { %961 = dma.done.wait [#allocation6], 128  }
 0x2e6   :  { %962 = vsyncadd [#allocation6], 4294967168 }
 0x2e7   :  { %567 = vsyncpa [#allocation5], 1 }
 0x2e8   :  { %568 = vsyncpa [#allocation8], 1 }
 0x2e9   :  { %569 = vsyncpa [#allocation11], 1 }
 0x2ea   :  { %570 = vsyncpa [#allocation14], 1 }
 0x2eb   :  { %571 = vsyncpa [#allocation6], 1 }

// kernel: tpu_custom_call.1
= control target key start
LH: loop header
LB: loop body
LE: loop exit
PB: predicated region body
PF: predicated region fallthrough
CT: control target
= control target key end

     0   :  { %15 = vsyncpa [#allocation5], 0  ;;  %s1075_s0 = inlined_call_operand.hbm [shape: bf16[8,128], index: 0, kind: input, shape index: {}]   ;;  %s1076_s1 = inlined_call_operand.hbm [shape: bf16[128,128], index: 1, kind: input, shape index: {}]   ;;  %s1077_s2 = inlined_call_operand.vmem [shape: f32[1,128], index: 2, kind: input, shape index: {}]   ;;  %s1078_s3 = inlined_call_operand.hbm [shape: bf16[128,128], index: 3, kind: input, shape index: {}]   ;;  %s1079_s4 = inlined_call_operand.vmem [shape: f32[1,128], index: 4, kind: input, shape index: {}]   ;;  %s1080_s5 = inlined_call_operand.hbm [shape: bf16[128,128], index: 5, kind: input, shape index: {}]   ;;  %s1081_s6 = inlined_call_operand.vmem [shape: f32[1,128], index: 6, kind: input, shape index: {}]   ;;  %s1082_s7 = inlined_call_operand.hbm [shape: bf16[128,128], index: 7, kind: input, shape index: {}]   ;;  %s1083_s8 = inlined_call_operand.vmem [shape: f32[1,128], index: 8, kind: input, shape index: {}]   ;;  %s1084_s9 = inlined_call_operand.hbm [shape: bf16[128,128], index: 9, kind: input, shape index: {}]   ;;  %s1085_s10 = inlined_call_operand.hbm [shape: f32[8,128], index: 10, kind: output, shape index: {}]  }
   0x1   :  { %16 = vsyncpa [#allocation8], 0 }
   0x2   :  { %17 = vsyncpa [#allocation11], 0 }
   0x3   :  { %18 = vsyncpa [#allocation14], 0  ;;  %s35_s15 = sshll.u32 %s1076_s1, 4  ;;  %s36_s15 = int_to_ptr.hbm [resolvable:$true] %s35_s15 }
   0x4   :  { %19 = vsyncpa [#allocation6], 0  ;;  %s963_s16 = smov [#allocation7]   ;;  %s65_s20 = sshll.u32 %s1080_s5, 4  ;;  %s66_s20 = int_to_ptr.hbm [resolvable:$true] %s65_s20 }
   0x5   :  { %s37_s17 = sshll.u32 %s963_s16, 4  ;;  %s964_s21 = smov 64   ;;  %s38_s17 = int_to_ptr.vmem [resolvable:$true] %s37_s17 }
   0x6   :  { %s965_s22 = smov 4   ;;  %s966_s23 = smov [#allocation10]  }
   0x7   :  { %43 = dma.hbm_to_vmem [thread:$0]  %s36_s15, 1024, %s38_s17, [#allocation8], %s964_s21, %s964_s21, %s965_s22  }
   0x8   :  { %s67_s24 = sshll.u32 %s966_s23, 4  ;;  %s25_s26 = sshll.u32 %s1075_s0, 4  ;;  %s68_s24 = int_to_ptr.vmem [resolvable:$true] %s67_s24  ;;  %s26_s26 = int_to_ptr.hbm [resolvable:$true] %s25_s26 }
   0x9   :  { %73 = dma.hbm_to_vmem [thread:$0]  %s66_s20, 1024, %s68_s24, [#allocation11], %s964_s21, %s964_s21, %s965_s22  }
   0xa   :  { %s50_s28 = sshll.u32 %s1078_s3, 4  ;;  %s967_s29 = smov [#allocation4]   ;;  %s51_s28 = int_to_ptr.hbm [resolvable:$true] %s50_s28 }
   0xb   :  { %s27_s30 = sshll.u32 %s967_s29, 4  ;;  %s968_s11 = smov [#allocation9]   ;;  %s28_s30 = int_to_ptr.vmem [resolvable:$true] %s27_s30 }
   0xc   :  { %30 = dma.hbm_to_vmem [thread:$0]  %s26_s26, 64, %s28_s30, [#allocation5]  }
   0xd   :  { %s52_s12 = sshll.u32 %s968_s11, 4  ;;  %s80_s0 = sshll.u32 %s1082_s7, 4  ;;  %s53_s12 = int_to_ptr.vmem [resolvable:$true] %s52_s12  ;;  %s81_s0 = int_to_ptr.hbm [resolvable:$true] %s80_s0 }
   0xe   :  { %58 = dma.hbm_to_vmem [thread:$0]  %s51_s28, 1024, %s53_s12, [#allocation8], %s964_s21, %s964_s21, %s965_s22  }
   0xf   :  { %s95_s3 = sshll.u32 %s1084_s9, 4  ;;  %s969_s17 = smov [#allocation12]   ;;  %s96_s3 = int_to_ptr.hbm [resolvable:$true] %s95_s3 }
  0x10   :  { %s82_s18 = sshll.u32 %s969_s17, 4  ;;  %s970_s19 = smov [#allocation13]   ;;  %s83_s18 = int_to_ptr.vmem [resolvable:$true] %s82_s18 }
  0x11   :  { %88 = dma.hbm_to_vmem [thread:$0]  %s81_s0, 1024, %s83_s18, [#allocation11], %s964_s21, %s964_s21, %s965_s22  }
  0x12   :  { %s97_s7 = sshll.u32 %s970_s19, 4  ;;  %s98_s7 = int_to_ptr.vmem [resolvable:$true] %s97_s7 }
  0x13   :  { %103 = dma.hbm_to_vmem [thread:$0]  %s96_s3, 1024, %s98_s7, [#allocation14], %s964_s21, %s964_s21, %s965_s22  }
  0x14   :  { %953 = dma.done.wait [#allocation5], 64  }
  0x15   :  { %954 = vsyncadd [#allocation5], 4294967232 }
  0x16   :  { %955 = dma.done.wait [#allocation8], 2048  }
  0x17   :  { %956 = vsyncadd [#allocation8], 4294965248 }
  0x18   :  { %957 = dma.done.wait [#allocation11], 2048  }
  0x19   :  { %958 = vsyncadd [#allocation11], 4294965248 }
  0x1a   :  { %959 = dma.done.wait [#allocation14], 1024  }
  0x1b   :  { %960 = vsyncadd [#allocation14], 4294966272  ;;  %v739_v0 = vld [vmem:[#allocation7 + $0x38] sm:$0xff]  ;;  %v738_v1 = vld [vmem:[#allocation7 + $0x30] sm:$0xff]  ;;  %s559_s5 = sshll.u32 %s1085_s10, 4  ;;  %s560_s5 = int_to_ptr.hbm [resolvable:$true] %s559_s5 }
  0x1c   :  { %197 = vmatpush.bf16.msra.mxu0 %v739_v0  ;;  %v747_v2 = vld [vmem:[#allocation9 + $0x38] sm:$0xff]  ;;  %v746_v3 = vld [vmem:[#allocation9 + $0x30] sm:$0xff]  ;;  %v737_v4 = vld [vmem:[#allocation7 + $0x28] sm:$0xff] }
  0x1d   :  { %287 = vmatpush.bf16.msra.mxu1 %v747_v2  ;;  %v745_v5 = vld [vmem:[#allocation9 + $0x28] sm:$0xff]  ;;  %v736_v6 = vld [vmem:[#allocation7 + $0x20] sm:$0xff]  ;;  %v735_v8 = vld [vmem:[#allocation7 + $0x18] sm:$0xff] }
  0x1e   :  { %v744_v7 = vld [vmem:[#allocation9 + $0x20] sm:$0xff]  ;;  %v743_v9 = vld [vmem:[#allocation9 + $0x18] sm:$0xff]  ;;  %v734_v10 = vld [vmem:[#allocation7 + $0x10] sm:$0xff] }
  0x1f   :  { %v742_v11 = vld [vmem:[#allocation9 + $0x10] sm:$0xff]  ;;  %v733_v12 = vld [vmem:[#allocation7 + $0x8] sm:$0xff]  ;;  %v732_v13 = vld [vmem:[#allocation7] sm:$0xff] }
  0x20   :  { %198 = vmatpush.bf16.msra.mxu0 %v738_v1  ;;  %v132_v14 = vld [vmem:[#allocation4] sm:$0xf]  ;;  %v741_v15 = vld [vmem:[#allocation9 + $0x8] sm:$0xff]  ;;  %v740_v16 = vld [vmem:[#allocation9] sm:$0xff] }
  0x21   :  { %288 = vmatpush.bf16.msra.mxu1 %v746_v3  ;;  %v755_v17 = vld [vmem:[#allocation10 + $0x38] sm:$0xff]  ;;  %v754_v18 = vld [vmem:[#allocation10 + $0x30] sm:$0xff]  ;;  %v753_v19 = vld [vmem:[#allocation10 + $0x28] sm:$0xff] }
  0x22   :  { %370 = vmatpush.bf16.msra.mxu2 %v755_v17  ;;  %v752_v20 = vld [vmem:[#allocation10 + $0x20] sm:$0xff]  ;;  %v751_v21 = vld [vmem:[#allocation10 + $0x18] sm:$0xff]  ;;  %v750_v22 = vld [vmem:[#allocation10 + $0x10] sm:$0xff] }
  0x23   :  { %v781_v23 = vld [vmem:[%s1077_s2] ss:$0 sm:$0xff]  ;;  %v749_v29 = vld [vmem:[#allocation10 + $0x8] sm:$0xff]  ;;  %v748_v30 = vld [vmem:[#allocation10] sm:$0xff] }
  0x24   :  { %199 = vmatpush.bf16.msra.mxu0 %v737_v4  ;;  %v763_v31 = vld [vmem:[#allocation12 + $0x38] sm:$0xff]  ;;  %v762_v32 = vld [vmem:[#allocation12 + $0x30] sm:$0xff]  ;;  %v761_v33 = vld [vmem:[#allocation12 + $0x28] sm:$0xff] }
  0x25   :  { %289 = vmatpush.bf16.msra.mxu1 %v745_v5  ;;  %453 = vmatpush.bf16.msra.mxu3 %v763_v31  ;;  %v760_v34 = vld [vmem:[#allocation12 + $0x20] sm:$0xff]  ;;  %v759_v35 = vld [vmem:[#allocation12 + $0x18] sm:$0xff]  ;;  %v758_v36 = vld [vmem:[#allocation12 + $0x10] sm:$0xff] }
  0x26   :  { %371 = vmatpush.bf16.msra.mxu2 %v754_v18  ;;  %v782_v37 = vld [vmem:[%s1079_s4] ss:$0 sm:$0xff]  ;;  %v757_v43 = vld [vmem:[#allocation12 + $0x8] sm:$0xff]  ;;  %v756_v44 = vld [vmem:[#allocation12] sm:$0xff] }
  0x27   :  { %v771_v45 = vld [vmem:[#allocation13 + $0x38] sm:$0xff]  ;;  %v770_v46 = vld [vmem:[#allocation13 + $0x30] sm:$0xff]  ;;  %v769_v47 = vld [vmem:[#allocation13 + $0x28] sm:$0xff] }
  0x28   :  { %200 = vmatpush.bf16.msra.mxu0 %v736_v6  ;;  %v768_v48 = vld [vmem:[#allocation13 + $0x20] sm:$0xff]  ;;  %v783_v49 = vld [vmem:[%s1081_s6] ss:$0 sm:$0xff]  ;;  %v766_v56 = vld [vmem:[#allocation13 + $0x10] sm:$0xff]  ;;  %s971_s6 = smov [#allocation15]  }
  0x29   :  { %290 = vmatpush.bf16.msra.mxu1 %v744_v7  ;;  %454 = vmatpush.bf16.msra.mxu3 %v762_v32  ;;  %v767_v55 = vld [vmem:[#allocation13 + $0x18] sm:$0xff]  ;;  %v765_v57 = vld [vmem:[#allocation13 + $0x8] sm:$0xff]  ;;  %v764_v58 = vld [vmem:[#allocation13] sm:$0xff]  ;;  %s557_s25 = sshll.u32 %s971_s6, 4  ;;  %s558_s25 = int_to_ptr.vmem [resolvable:$true] %s557_s25 }
  0x2a   :  { %372 = vmatpush.bf16.msra.mxu2 %v753_v19  ;;  %v784_v59 = vld [vmem:[%s1083_s8] ss:$0 sm:$0xff] }
  0x2c   :  { %201 = vmatpush.bf16.msra.mxu0 %v735_v8 }
  0x2d   :  { %291 = vmatpush.bf16.msra.mxu1 %v743_v9  ;;  %455 = vmatpush.bf16.msra.mxu3 %v761_v33 }
  0x2e   :  { %373 = vmatpush.bf16.msra.mxu2 %v752_v20 }
  0x30   :  { %202 = vmatpush.bf16.msra.mxu0 %v734_v10 }
  0x31   :  { %292 = vmatpush.bf16.msra.mxu1 %v742_v11  ;;  %456 = vmatpush.bf16.msra.mxu3 %v760_v34 }
  0x32   :  { %374 = vmatpush.bf16.msra.mxu2 %v751_v21 }
  0x34   :  { %203 = vmatpush.bf16.msra.mxu0 %v733_v12 }
  0x35   :  { %293 = vmatpush.bf16.msra.mxu1 %v741_v15  ;;  %457 = vmatpush.bf16.msra.mxu3 %v759_v35 }
  0x36   :  { %375 = vmatpush.bf16.msra.mxu2 %v750_v22 }
  0x38   :  { %204 = vmatpush.bf16.msra.mxu0 %v732_v13 }
  0x39   :  { %294 = vmatpush.bf16.msra.mxu1 %v740_v16  ;;  %458 = vmatpush.bf16.msra.mxu3 %v758_v36 }
  0x3a   :  { %376 = vmatpush.bf16.msra.mxu2 %v749_v29 }
  0x3b   :  { %205 = vmatmul.bf16.vlgmr.msra.gmra.mxu0 %v132_v14 }
  0x3c   :  { %538 = vmatpush.bf16.msrb.mxu0 %v771_v45 }
  0x3d   :  { %459 = vmatpush.bf16.msra.mxu3 %v757_v43 }
  0x3e   :  { %377 = vmatpush.bf16.msra.mxu2 %v748_v30 }
  0x40   :  { %539 = vmatpush.bf16.msrb.mxu0 %v770_v46 }
  0x41   :  { %460 = vmatpush.bf16.msra.mxu3 %v756_v44 }
  0x44   :  { %540 = vmatpush.bf16.msrb.mxu0 %v769_v47 }
  0x48   :  { %541 = vmatpush.bf16.msrb.mxu0 %v768_v48 }
  0x4c   :  { %542 = vmatpush.bf16.msrb.mxu0 %v767_v55 }
  0x50   :  { %543 = vmatpush.bf16.msrb.mxu0 %v766_v56 }
  0x54   :  { %544 = vmatpush.bf16.msrb.mxu0 %v765_v57 }
  0x58   :  { %545 = vmatpush.bf16.msrb.mxu0 %v764_v58 }
  0xb8   :  { %v206_v24 = vpop.f32.mrf.mxu0 }
  0xb9   :  { %v216_v25 = vadd.f32 %v781_v23, %v206_v24 }
  0xbb   :  { %v217_v26 = vmax.f32 %v216_v25, 0.0 }
  0xbd   :  { %v218_v27 = vpack.c.bf16 %v217_v26, %v217_v26 }
  0xbf   :  { %295 = vmatmul.bf16.vlgmr.msra.gmra.mxu1 %v218_v27 }
  0xc0   :  { %v208_v28 = vpop.f32.mrf.mxu0 }
 0x13c   :  { %v296_v38 = vpop.f32.mrf.mxu1 }
 0x13d   :  { %v297_v39 = vadd.f32 %v782_v37, %v296_v38 }
 0x13f   :  { %v300_v40 = vmax.f32 %v297_v39, 0.0 }
 0x141   :  { %v301_v41 = vpack.c.bf16 %v300_v40, %v300_v40 }
 0x143   :  { %378 = vmatmul.bf16.vlgmr.msra.gmra.mxu2 %v301_v41 }
 0x144   :  { %v298_v42 = vpop.f32.mrf.mxu1 }
 0x1c6   :  { %v379_v50 = vpop.f32.mrf.mxu2 }
 0x1c7   :  { %v380_v51 = vadd.f32 %v783_v49, %v379_v50 }
 0x1c9   :  { %v383_v52 = vmax.f32 %v380_v51, 0.0 }
 0x1cb   :  { %v384_v53 = vpack.c.bf16 %v383_v52, %v383_v52 }
 0x1cd   :  { %461 = vmatmul.bf16.vlgmr.msra.gmra.mxu3 %v384_v53 }
 0x1ce   :  { %v381_v54 = vpop.f32.mrf.mxu2 }
 0x250   :  { %v462_v60 = vpop.f32.mrf.mxu3 }
 0x251   :  { %v463_v61 = vadd.f32 %v784_v59, %v462_v60 }
 0x253   :  { %v466_v62 = vmax.f32 %v463_v61, 0.0 }
 0x255   :  { %v467_v63 = vpack.c.bf16 %v466_v62, %v466_v62 }
 0x257   :  { %468 = vst [vmem:[#allocation3] sm:$0xf] %v467_v63 }
 0x258   :  { %v464_v0 = vpop.f32.mrf.mxu3 }
 0x25e   :  { %v473_v1 = vld [vmem:[#allocation3] sm:$0xf] }
 0x25f   :  { %546 = vmatmul.bf16.vlgmr.msrb.gmra.mxu0 %v473_v1 }
 0x2dc   :  { %v547_v2 = vpop.f32.mrf.mxu0 }
 0x2dd   :  { %551 = vst [vmem:[#allocation15] sm:$0xff] %v547_v2 }
 0x2de   :  { %562 = dma.vmem_to_hbm [thread:$0]  %s558_s25, 128, %s560_s5, [#allocation6]  }
 0x2e4   :  { %v549_v3 = vpop.f32.mrf.mxu0 }
 0x2e5   :  { %961 = dma.done.wait [#allocation6], 128  }
 0x2e6   :  { %962 = vsyncadd [#allocation6], 4294967168 }
 0x2e7   :  { %567 = vsyncpa [#allocation5], 1 }
 0x2e8   :  { %568 = vsyncpa [#allocation8], 1 }
 0x2e9   :  { %569 = vsyncpa [#allocation11], 1 }
 0x2ea   :  { %570 = vsyncpa [#allocation14], 1 }
 0x2eb   :  { %571 = vsyncpa [#allocation6], 1 }

</bundles_post_ra>
